<compile_context>
chip_gen: v7x
topology: tpu7x:2x2x1
jax: 0.10.0
libtpu: 0.0.40
codegen_flags: <defaults>
</compile_context>

<pallas_src>
import functools

import jax
import jax.numpy as jnp
import numpy as np
from jax.experimental import pallas as pl
from jax.experimental.pallas import tpu as pltpu

# ----------------------------- model sizes -----------------------------
B = 2            # number of graphs (point clouds) in the batch
P = 64           # points per graph (dense batching); must be multiple of 8
N = B * P        # total localisations
F_X = 4          # per-localisation feature dim (data.x)
F_POS = 2        # spatial dim (data.pos), 2D SMLM localisations
F_IN = F_X + F_POS
H1 = 32          # hidden dim of first shared MLP layer
H2 = 64          # hidden dim of second shared MLP layer (embedding dim)
C = 4            # number of output classes

assert P % 8 == 0, "pts_per_graph must be a multiple of 8 so the pooling " \
                   "reshape is a free sublane split (no relayout copy)"


# ------------------------------ kernel ---------------------------------
def _loconly_kernel(x_ref, pos_ref,
                    w1x_ref, w1p_ref, b1_ref, w2_ref, b2_ref, w3_ref, b3_ref,
                    out_ref, *, num_graphs, pts_per_graph):
    # In-kernel cast (no-op for f32 inputs; rides the VPU slot for bf16/f16
    # inputs instead of a separate wrapper-side XLA cast op).
    x = x_ref[...].astype(jnp.float32)
    pos = pos_ref[...].astype(jnp.float32)

    # ---- shared per-point MLP ------------------------------------------
    # concat([x, pos]) @ w1  ==  x @ w1x + pos @ w1pos  (w1 pre-split at
    # init; avoids both a wrapper concat and a mid-sublane-group slice).
    h = jnp.dot(x, w1x_ref[...], preferred_element_type=jnp.float32)
    h = h + jnp.dot(pos, w1p_ref[...], preferred_element_type=jnp.float32)
    h = jnp.maximum(h + b1_ref[...], 0.0)                        # (N, H1)
    h = jnp.dot(h, w2_ref[...], preferred_element_type=jnp.float32)
    h = jnp.maximum(h + b2_ref[...], 0.0)                        # (N, H2)

    # ---- global_max_pool (dense, contiguous, equal-size graphs) --------
    # (N, H2) -> (B, P, H2) is a tile-aligned leading-dim split (free since
    # P % 8 == 0); max over axis=1 is a single sublane reduction per graph.
    pooled = jnp.max(h.reshape(num_graphs, pts_per_graph, H2), axis=1)  # (B, H2)

    # ---- classifier head + log_softmax(dim=-1) --------------------------
    logits = jnp.dot(pooled, w3_ref[...],
                     preferred_element_type=jnp.float32) + b3_ref[...]  # (B, C)
    m = jnp.max(logits, axis=-1, keepdims=True)
    lse = m + jnp.log(jnp.sum(jnp.exp(logits - m), axis=-1, keepdims=True))
    out_ref[...] = logits - lse


def _check_dense_batch(batch):
    """Host-side guard for the dense-contiguous-batch assumption."""
    try:
        b = np.asarray(batch)
    except Exception:
        # Traced (inside jit) — cannot check at runtime here; assumption
        # documented in the module docstring / TODO.
        return
    expected = np.repeat(np.arange(B, dtype=np.int32), P)
    if b.shape != expected.shape or not np.array_equal(b, expected):
        raise ValueError(
            "loc_only_net currently assumes dense contiguous equal-size "
            "graphs ([0]*P ++ [1]*P ++ ...); got a different batch vector. "
            "Ragged/permuted batching needs the segment-max path (TODO).")


def loc_only_net(x, pos, batch, params):
    """LocOnlyNet forward.

    x:(N,F_X), pos:(N,F_POS), batch:(N,) int32 (must be dense contiguous:
    [0]*P ++ [1]*P ++ ...; validated host-side, not shipped to the kernel).

    NOTE: if this net is called repeatedly (per-event inference), amortize
    launch cost by stacking more clouds into one call (grow B) rather than
    issuing many tiny pallas_calls.
    """
    _check_dense_batch(batch)
    w1x, w1p, b1, w2, b2, w3, b3 = params

    kernel = functools.partial(_loconly_kernel,
                               num_graphs=B, pts_per_graph=P)
    return pl.pallas_call(
        kernel,
        out_shape=jax.ShapeDtypeStruct((B, C), jnp.float32),
        in_specs=[pl.BlockSpec(memory_space=pltpu.VMEM)] * 9,
        out_specs=pl.BlockSpec(memory_space=pltpu.VMEM),
    )(x, pos, w1x, w1p, b1, w2, b2, w3, b3)


# ------------------------- deterministic init ---------------------------
def init_params(key):
    ks = jax.random.split(key, 6)

    def lin(kw, kb, fan_in, fan_out):
        lim = 1.0 / np.sqrt(fan_in)
        w = jax.random.uniform(kw, (fan_in, fan_out), jnp.float32, -lim, lim)
        # biases stored as (1, fan_out) so neither wrapper nor kernel reshapes
        b = jax.random.uniform(kb, (1, fan_out), jnp.float32, -lim, lim)
        return w, b

    w1, b1 = lin(ks[0], ks[1], F_IN, H1)
    # Pre-split the first-layer weight so the kernel never slices a
    # sub-(8,128) tile mid-sublane-group.
    w1x, w1p = w1[:F_X, :], w1[F_X:, :]
    w2, b2 = lin(ks[2], ks[3], H1, H2)
    w3, b3 = lin(ks[4], ks[5], H2, C)
    return (w1x, w1p, b1, w2, b2, w3, b3)


def _reference(x, pos, batch, params):
    """Pure-JAX reference with true segment-max semantics."""
    w1x, w1p, b1, w2, b2, w3, b3 = params
    w1 = jnp.concatenate([w1x, w1p], axis=0)
    xin = jnp.concatenate([x.astype(jnp.float32), pos.astype(jnp.float32)],
                          axis=-1)
    h = jnp.maximum(xin @ w1 + b1, 0.0)
    h = jnp.maximum(h @ w2 + b2, 0.0)
    pooled = jnp.stack([
        jnp.max(jnp.where((batch == g)[:, None], h, -jnp.inf), axis=0)
        for g in range(B)])
    logits = pooled @ w3 + b3
    return jax.nn.log_softmax(logits, axis=-1)


if __name__ == "__main__":
    key = jax.random.PRNGKey(0)
    kx, kpos, kp = jax.random.split(key, 3)

    x = jax.random.normal(kx, (N, F_X), jnp.float32)
    pos = jax.random.uniform(kpos, (N, F_POS), jnp.float32)
    batch = jnp.repeat(jnp.arange(B, dtype=jnp.int32), P)   # dense batching
    params = init_params(kp)

    out = loc_only_net(x, pos, batch, params)
    out = jax.block_until_ready(out)

    ref = _reference(x, pos, batch, params)
    np.testing.assert_allclose(np.asarray(out), np.asarray(ref),
                               rtol=1e-5, atol=1e-5)
    print("KERNEL_OK")
</pallas_src>

<mosaic_0001>
module attributes {stable_mosaic.version = 11 : i64} {
  func.func @_loconly_kernel(%arg0: memref<128x4xf32, #tpu.memory_space<vmem>>, %arg1: memref<128x2xf32, #tpu.memory_space<vmem>>, %arg2: memref<4x32xf32, #tpu.memory_space<vmem>>, %arg3: memref<2x32xf32, #tpu.memory_space<vmem>>, %arg4: memref<1x32xf32, #tpu.memory_space<vmem>>, %arg5: memref<32x64xf32, #tpu.memory_space<vmem>>, %arg6: memref<1x64xf32, #tpu.memory_space<vmem>>, %arg7: memref<64x4xf32, #tpu.memory_space<vmem>>, %arg8: memref<1x4xf32, #tpu.memory_space<vmem>>, %arg9: memref<2x4xf32, #tpu.memory_space<vmem>>) attributes {dimension_semantics = [], scalar_prefetch = 0 : i64, scratch_operands = 0 : i64, tpu.core_type = #tpu.core_type<tc>} {
    %c0 = arith.constant 0 : index
    %c0_0 = arith.constant 0 : index
    %0 = vector.load %arg0[%c0, %c0_0] : memref<128x4xf32, #tpu.memory_space<vmem>>, vector<128x4xf32>
    %c0_1 = arith.constant 0 : index
    %c0_2 = arith.constant 0 : index
    %1 = vector.load %arg1[%c0_1, %c0_2] : memref<128x2xf32, #tpu.memory_space<vmem>>, vector<128x2xf32>
    %c0_3 = arith.constant 0 : index
    %c0_4 = arith.constant 0 : index
    %2 = vector.load %arg2[%c0_3, %c0_4] : memref<4x32xf32, #tpu.memory_space<vmem>>, vector<4x32xf32>
    %cst = arith.constant dense<0.000000e+00> : vector<128x32xf32>
    %3 = tpu.matmul %0, %2, %cst {dimension_numbers = #tpu.dot_dimension_numbers<[1], [0], [0], [1], [0, 0, 1, 1], [], []>} : vector<128x4xf32>, vector<4x32xf32>, vector<128x32xf32> -> vector<128x32xf32>
    %c0_5 = arith.constant 0 : index
    %c0_6 = arith.constant 0 : index
    %4 = vector.load %arg3[%c0_5, %c0_6] : memref<2x32xf32, #tpu.memory_space<vmem>>, vector<2x32xf32>
    %cst_7 = arith.constant dense<0.000000e+00> : vector<128x32xf32>
    %5 = tpu.matmul %1, %4, %cst_7 {dimension_numbers = #tpu.dot_dimension_numbers<[1], [0], [0], [1], [0, 0, 1, 1], [], []>} : vector<128x2xf32>, vector<2x32xf32>, vector<128x32xf32> -> vector<128x32xf32>
    %6 = arith.addf %3, %5 : vector<128x32xf32>
    %c0_8 = arith.constant 0 : index
    %c0_9 = arith.constant 0 : index
    %7 = vector.load %arg4[%c0_8, %c0_9] : memref<1x32xf32, #tpu.memory_space<vmem>>, vector<1x32xf32>
    %8 = vector.broadcast %7 : vector<1x32xf32> to vector<128x32xf32>
    %9 = arith.addf %6, %8 : vector<128x32xf32>
    %cst_10 = arith.constant 0.000000e+00 : f32
    %10 = vector.broadcast %cst_10 : f32 to vector<128x32xf32>
    %11 = arith.maximumf %9, %10 : vector<128x32xf32>
    %c0_11 = arith.constant 0 : index
    %c0_12 = arith.constant 0 : index
    %12 = vector.load %arg5[%c0_11, %c0_12] : memref<32x64xf32, #tpu.memory_space<vmem>>, vector<32x64xf32>
    %cst_13 = arith.constant dense<0.000000e+00> : vector<128x64xf32>
    %13 = tpu.matmul %11, %12, %cst_13 {dimension_numbers = #tpu.dot_dimension_numbers<[1], [0], [0], [1], [0, 0, 1, 1], [], []>} : vector<128x32xf32>, vector<32x64xf32>, vector<128x64xf32> -> vector<128x64xf32>
    %c0_14 = arith.constant 0 : index
    %c0_15 = arith.constant 0 : index
    %14 = vector.load %arg6[%c0_14, %c0_15] : memref<1x64xf32, #tpu.memory_space<vmem>>, vector<1x64xf32>
    %15 = vector.broadcast %14 : vector<1x64xf32> to vector<128x64xf32>
    %16 = arith.addf %13, %15 : vector<128x64xf32>
    %cst_16 = arith.constant 0.000000e+00 : f32
    %17 = vector.broadcast %cst_16 : f32 to vector<128x64xf32>
    %18 = arith.maximumf %16, %17 : vector<128x64xf32>
    %19 = vector.shape_cast %18 : vector<128x64xf32> to vector<2x64x64xf32>
    %cst_17 = arith.constant dense<0xFF800000> : vector<2x64xf32>
    %20 = vector.multi_reduction <maximumf>, %19, %cst_17 [1] : vector<2x64x64xf32> to vector<2x64xf32>
    %c0_18 = arith.constant 0 : index
    %c0_19 = arith.constant 0 : index
    %21 = vector.load %arg7[%c0_18, %c0_19] : memref<64x4xf32, #tpu.memory_space<vmem>>, vector<64x4xf32>
    %cst_20 = arith.constant dense<0.000000e+00> : vector<2x4xf32>
    %22 = tpu.matmul %20, %21, %cst_20 {dimension_numbers = #tpu.dot_dimension_numbers<[1], [0], [0], [1], [0, 0, 1, 1], [], []>} : vector<2x64xf32>, vector<64x4xf32>, vector<2x4xf32> -> vector<2x4xf32>
    %c0_21 = arith.constant 0 : index
    %c0_22 = arith.constant 0 : index
    %23 = vector.load %arg8[%c0_21, %c0_22] : memref<1x4xf32, #tpu.memory_space<vmem>>, vector<1x4xf32>
    %24 = vector.broadcast %23 : vector<1x4xf32> to vector<2x4xf32>
    %25 = arith.addf %22, %24 : vector<2x4xf32>
    %cst_23 = arith.constant dense<0xFF800000> : vector<2xf32>
    %26 = vector.multi_reduction <maximumf>, %25, %cst_23 [1] : vector<2x4xf32> to vector<2xf32>
    %27 = vector.shape_cast %26 : vector<2xf32> to vector<2x1xf32>
    %28 = vector.broadcast %27 : vector<2x1xf32> to vector<2x4xf32>
    %29 = arith.subf %25, %28 : vector<2x4xf32>
    %30 = math.exp %29 : vector<2x4xf32>
    %cst_24 = arith.constant dense<0.000000e+00> : vector<2xf32>
    %31 = vector.multi_reduction <add>, %30, %cst_24 [1] : vector<2x4xf32> to vector<2xf32>
    %32 = vector.shape_cast %31 : vector<2xf32> to vector<2x1xf32>
    %33 = math.log %32 : vector<2x1xf32>
    %34 = arith.addf %27, %33 : vector<2x1xf32>
    %35 = vector.broadcast %34 : vector<2x1xf32> to vector<2x4xf32>
    %36 = arith.subf %25, %35 : vector<2x4xf32>
    %c0_25 = arith.constant 0 : index
    %c0_26 = arith.constant 0 : index
    %37 = vector.load %arg9[%c0_25, %c0_26] : memref<2x4xf32, #tpu.memory_space<vmem>>, vector<2x4xf32>
    tpu.vector_store %arg9[%c0_25, %c0_26], %36 {strides = array<i32>} : memref<2x4xf32, #tpu.memory_space<vmem>>, vector<2x4xf32>,
    return
  }
}

</mosaic_0001>

<bundles_post_ra>
// kernel: tpu_custom_call.1
= control target key start
LH: loop header
LB: loop body
LE: loop exit
PB: predicated region body
PF: predicated region fallthrough
CT: control target
= control target key end

     0   :  { %vm116_vm0 = vcmask 1041408   ;;  %vm67_vm1 = vcmask 15360   ;;  %vm314_vm2 = vcmask 1043456   ;;  %s1500_s0 = inlined_call_operand.vmem [shape: f32[128,4], index: 0, kind: input, shape index: {}]   ;;  %s1501_s1 = inlined_call_operand.vmem [shape: f32[128,2], index: 1, kind: input, shape index: {}]   ;;  %s1502_s2 = inlined_call_operand.vmem [shape: f32[4,32], index: 2, kind: input, shape index: {}]   ;;  %s1503_s3 = inlined_call_operand.vmem [shape: f32[2,32], index: 3, kind: input, shape index: {}]   ;;  %s1504_s4 = inlined_call_operand.vmem [shape: f32[1,32], index: 4, kind: input, shape index: {}]   ;;  %s1505_s5 = inlined_call_operand.vmem [shape: f32[32,64], index: 5, kind: input, shape index: {}]   ;;  %s1506_s6 = inlined_call_operand.vmem [shape: f32[1,64], index: 6, kind: input, shape index: {}]   ;;  %s1507_s7 = inlined_call_operand.vmem [shape: f32[64,4], index: 7, kind: input, shape index: {}]   ;;  %s1508_s8 = inlined_call_operand.vmem [shape: f32[1,4], index: 8, kind: input, shape index: {}]   ;;  %s1509_s9 = inlined_call_operand.hbm [shape: f32[2,4], index: 9, kind: output, shape index: {}]  }
   0x1   :  { %v66_v0 = vld [vmem:[%s1503_s3] sm:$0x3]  ;;  %v50_v2 = vld [vmem:[%s1501_s1 + $0x8] sm:$0xff]  ;;  %v51_v4 = vld [vmem:[%s1501_s1 + $0x10] sm:$0xff] }
   0x2   :  { %v49_v1 = vld [vmem:[%s1501_s1] sm:$0xff]  ;;  %1003 = vmatprep.subr.msk.mxu0 %vm116_vm0, %v66_v0  ;;  %1126 = vmatprep.subr.msk.mxu1 %vm116_vm0, %v66_v0  ;;  %v52_v5 = vld [vmem:[%s1501_s1 + $0x18] sm:$0xff]  ;;  %v59_v7 = vld [vmem:[%s1501_s1 + $0x50] sm:$0xff] }
   0x3   :  { %1005 = vmatprep.mubr.msk.f32.mxu0 %vm67_vm1, %v49_v1  ;;  %v65_v3 = vld [vmem:[%s1502_s2] sm:$0xf]  ;;  %1004 = vmatpush3.msk.msra.mxu0 %vm116_vm0, %v66_v0  ;;  %v54_v8 = vld [vmem:[%s1501_s1 + $0x28] sm:$0xff]  ;;  %v60_v9 = vld [vmem:[%s1501_s1 + $0x58] sm:$0xff] }
   0x4   :  { %1006 = vmatmul.mubr.msk.f32.vlgmr.msra.gmra.mrb[0].mxu0 %vm67_vm1, %v50_v2  ;;  %1029 = vmatprep.subr.msk.mxu0 %vm314_vm2, %v65_v3  ;;  %v53_v6 = vld [vmem:[%s1501_s1 + $0x20] sm:$0xff]  ;;  %v55_v11 = vld [vmem:[%s1501_s1 + $0x30] sm:$0xff]  ;;  %v62_v12 = vld [vmem:[%s1501_s1 + $0x68] sm:$0xff] }
   0x5   :  { %1030 = vmatpush3.msk.msra.mxu0 %vm314_vm2, %v65_v3  ;;  %1008 = vmatprep.mubr.msk.f32.mxu0 %vm67_vm1, %v51_v4  ;;  %v61_v10 = vld [vmem:[%s1501_s1 + $0x60] sm:$0xff]  ;;  %v63_v13 = vld [vmem:[%s1501_s1 + $0x70] sm:$0xff]  ;;  %v503_v15 = vld [vmem:[%s1505_s5 + $0x8] sm:$0xff] }
   0x6   :  { %1127 = vmatpush3.msk.msra.mxu1 %vm116_vm0, %v66_v0  ;;  %1020 = vmatprep.mubr.msk.f32.mxu1 %vm67_vm1, %v59_v7  ;;  %v502_v14 = vld [vmem:[%s1505_s5] sm:$0xff]  ;;  %v56_v16 = vld [vmem:[%s1501_s1 + $0x38] sm:$0xff] }
   0x7   :  { %1021 = vmatmul.mubr.msk.f32.vlgmr.msra.gmra.mrb[0].mxu1 %vm67_vm1, %v60_v9  ;;  %v1106_v17 = vpack.c.bf16 %v503_v15, %v502_v14 }
   0x8   :  { %1009 = vmatmul.mubr.msk.f32.gmra.mrb[2].mxu0 %vm67_vm1, %v52_v5  ;;  %1023 = vmatprep.mubr.msk.f32.mxu1 %vm67_vm1, %v61_v10 }
   0x9   :  { %1011 = vmatprep.mubr.msk.f32.mxu0 %vm67_vm1, %v53_v6 }
   0xc   :  { %1012 = vmatmul.mubr.msk.f32.gmra.mrb[4].mxu0 %vm67_vm1, %v54_v8 }
   0xd   :  { %1014 = vmatprep.mubr.msk.f32.mxu0 %vm67_vm1, %v55_v11 }
   0xe   :  { %14 = vsyncpa [#allocation3], 0  ;;  %v57_v18 = vld [vmem:[%s1501_s1 + $0x40] sm:$0xff]  ;;  %1024 = vmatmul.mubr.msk.f32.gmra.mrb[2].mxu1 %vm67_vm1, %v62_v12  ;;  %v64_v19 = vld [vmem:[%s1501_s1 + $0x78] sm:$0xff]  ;;  %1107 = vmatprep.subr.bf16.mxu1 %v1106_v17  ;;  %vm265_vm3 = vcmask 31744   ;;  %vm513_vm4 = vcmask 261120  }
   0xf   :  { %1026 = vmatprep.mubr.msk.f32.mxu1 %vm67_vm1, %v63_v13  ;;  %1109 = vmatpush3.bf16.msra.mxu1 %v1106_v17  ;;  %v58_v20 = vld [vmem:[%s1501_s1 + $0x48] sm:$0xff]  ;;  %v33_v21 = vld [vmem:[%s1500_s0] sm:$0xff]  ;;  %v35_v23 = vld [vmem:[%s1500_s0 + $0x10] sm:$0xff]  ;;  %vm1177_vm5 = vmmov 0   ;;  %vm723_vm6 = vcmask 523264   ;;  %vm783_vm7 = vcmask 1041409  }
  0x10   :  { %1015 = vmatmul.mubr.msk.f32.gmra.mrb[6].mxu0 %vm67_vm1, %v56_v16  ;;  %v34_v22 = vld [vmem:[%s1500_s0 + $0x8] sm:$0xff]  ;;  %v36_v24 = vld [vmem:[%s1500_s0 + $0x18] sm:$0xff]  ;;  %v37_v25 = vld [vmem:[%s1500_s0 + $0x20] sm:$0xff]  ;;  %vm857_vm8 = vcmask 25600  }
  0x11   :  { %1017 = vmatprep.mubr.msk.f32.mxu0 %vm67_vm1, %v57_v18  ;;  %v38_v26 = vld [vmem:[%s1500_s0 + $0x28] sm:$0xff]  ;;  %v39_v27 = vld [vmem:[%s1500_s0 + $0x30] sm:$0xff]  ;;  %v40_v28 = vld [vmem:[%s1500_s0 + $0x38] sm:$0xff] }
  0x12   :  { %1027 = vmatmul.mubr.msk.f32.gmra.mrb[4].mxu1 %vm67_vm1, %v64_v19  ;;  %v41_v29 = vld [vmem:[%s1500_s0 + $0x40] sm:$0xff]  ;;  %v42_v30 = vld [vmem:[%s1500_s0 + $0x48] sm:$0xff]  ;;  %v43_v31 = vld [vmem:[%s1500_s0 + $0x50] sm:$0xff] }
  0x13   :  { %v44_v32 = vld [vmem:[%s1500_s0 + $0x58] sm:$0xff]  ;;  %v45_v33 = vld [vmem:[%s1500_s0 + $0x60] sm:$0xff]  ;;  %v46_v34 = vld [vmem:[%s1500_s0 + $0x68] sm:$0xff] }
  0x14   :  { %1018 = vmatmul.mubr.msk.f32.gmra.mrb[8].mxu0 %vm67_vm1, %v58_v20  ;;  %v47_v35 = vld [vmem:[%s1500_s0 + $0x70] sm:$0xff]  ;;  %v48_v36 = vld [vmem:[%s1500_s0 + $0x78] sm:$0xff]  ;;  %v1385_v46 = vld [vmem:[%s1504_s4] ss:$0 sm:$0xff] }
  0x15   :  { %1031 = vmatprep.mubr.msk.f32.mxu0 %vm265_vm3, %v33_v21  ;;  %v504_v37 = vld [vmem:[%s1505_s5 + $0x10] sm:$0xff]  ;;  %v505_v38 = vld [vmem:[%s1505_s5 + $0x18] sm:$0xff] }
  0x16   :  { %v1110_v39 = vpack.c.bf16 %v505_v38, %v504_v37  ;;  %v766_v37 = vld [vmem:[%s1507_s7] sm:$0xff]  ;;  %v767_v38 = vld [vmem:[%s1507_s7 + $0x8] sm:$0xff] }
  0x18   :  { %1032 = vmatmul.mubr.msk.f32.vlgmr.msra.gmra.mrb[0].mxu0 %vm265_vm3, %v34_v22  ;;  %1111 = vmatprep.subr.bf16.mxu1 %v1110_v39 }
  0x19   :  { %1034 = vmatprep.mubr.msk.f32.mxu0 %vm265_vm3, %v35_v23  ;;  %1113 = vmatpush3.bf16.msra.mxu1 %v1110_v39  ;;  %v1176_v39 = vmov 0.0|0.0  }
  0x1a   :  { %1114 = vmatprep.subr.bf16.mxu1 %v1176_v39 }
  0x1c   :  { %1035 = vmatmul.mubr.msk.f32.gmra.mrb[2].mxu0 %vm265_vm3, %v36_v24 }
  0x1d   :  { %1037 = vmatprep.mubr.msk.f32.mxu0 %vm265_vm3, %v37_v25 }
  0x20   :  { %1038 = vmatmul.mubr.msk.f32.gmra.mrb[4].mxu0 %vm265_vm3, %v38_v26 }
  0x21   :  { %1040 = vmatprep.mubr.msk.f32.mxu0 %vm265_vm3, %v39_v27 }
  0x24   :  { %1041 = vmatmul.mubr.msk.f32.gmra.mrb[6].mxu0 %vm265_vm3, %v40_v28 }
  0x25   :  { %1043 = vmatprep.mubr.msk.f32.mxu0 %vm265_vm3, %v41_v29 }
  0x28   :  { %1044 = vmatmul.mubr.msk.f32.gmra.mrb[8].mxu0 %vm265_vm3, %v42_v30 }
  0x29   :  { %1046 = vmatprep.mubr.msk.f32.mxu0 %vm265_vm3, %v43_v31 }
  0x2c   :  { %1047 = vmatmul.mubr.msk.f32.gmra.mrb[10].mxu0 %vm265_vm3, %v44_v32 }
  0x2d   :  { %1049 = vmatprep.mubr.msk.f32.mxu0 %vm265_vm3, %v45_v33 }
  0x30   :  { %1050 = vmatmul.mubr.msk.f32.gmra.mrb[12].mxu0 %vm265_vm3, %v46_v34 }
  0x31   :  { %1052 = vmatprep.mubr.msk.f32.mxu0 %vm265_vm3, %v47_v35 }
  0x34   :  { %1053 = vmatmul.mubr.msk.f32.gmra.mrb[14].mxu0 %vm265_vm3, %v48_v36 }
  0xda   :  { %v1022_v40 = vpop.f32.mrb[0].mxu1 }
  0xdb   :  { %v236_v41 = vpop.f32.mrb[1].mxu1 }
  0xe1   :  { %v1025_v42 = vpop.f32.mrb[2].mxu1 }
  0xe2   :  { %v246_v43 = vpop.f32.mrb[3].mxu1 }
  0xe5   :  { %v1028_v44 = vpop.f32.mrb[4].mxu1 }
  0xe6   :  { %v1380_v45 = vpop.f32.mrb[5].mxu1 }
  0xeb   :  { %v1033_v47 = vpop.f32.mrb[0].mxu0 }
  0xec   :  { %v471_v48 = vadd.f32 %v1033_v47, %v1385_v46  ;;  %v384_v49 = vpop.f32.mrb[1].mxu0  ;;  %v772_v47 = vld [vmem:[%s1507_s7 + $0x30] sm:$0xff] }
  0xed   :  { %v470_v50 = vadd.f32 %v1385_v46, %v384_v49 }
  0xee   :  { %v487_v53 = vmax.f32 %v471_v48, 0.0  ;;  %v773_v48 = vld [vmem:[%s1507_s7 + $0x38] sm:$0xff] }
  0xef   :  { %v486_v51 = vmax.f32 %v470_v50, 0.0  ;;  %v1036_v52 = vpop.f32.mrb[2].mxu0  ;;  %v1124_v49 = vpack.c.bf16 %v773_v48, %v772_v47  ;;  %v1178_v50 = vmov 0.0  }
  0xf0   :  { %v473_v54 = vadd.f32 %v1036_v52, %v1385_v46  ;;  %v394_v55 = vpop.f32.mrb[3].mxu0 }
  0xf1   :  { %v472_v56 = vadd.f32 %v1385_v46, %v394_v55  ;;  %1063 = vmatprep.mubr.msk.f32.mxu1 %vm513_vm4, %v486_v51  ;;  %v1447_v51 = vld [vmem:[%s1506_s6] ss:$0 sm:$0xff] }
  0xf2   :  { %1064 = vmatmul.mubr.msk.f32.vlgmr.msra.gmra.mrb[6].mxu1 %vm513_vm4, %v487_v53  ;;  %v489_v59 = vmax.f32 %v473_v54, 0.0 }
  0xf3   :  { %v488_v57 = vmax.f32 %v472_v56, 0.0  ;;  %v1039_v58 = vpop.f32.mrb[4].mxu0 }
  0xf4   :  { %v475_v60 = vadd.f32 %v1039_v58, %v1385_v46  ;;  %v404_v61 = vpop.f32.mrb[5].mxu0 }
  0xf5   :  { %v474_v62 = vadd.f32 %v1385_v46, %v404_v61  ;;  %1066 = vmatprep.mubr.msk.f32.mxu1 %vm513_vm4, %v488_v57 }
  0xf6   :  { %1067 = vmatmul.mubr.msk.f32.gmra.mrb[8].mxu1 %vm513_vm4, %v489_v59  ;;  %v491_v1 = vmax.f32 %v475_v60, 0.0 }
  0xf7   :  { %v490_v63 = vmax.f32 %v474_v62, 0.0  ;;  %v1042_v0 = vpop.f32.mrb[6].mxu0 }
  0xf8   :  { %v477_v2 = vadd.f32 %v1042_v0, %v1385_v46  ;;  %v414_v3 = vpop.f32.mrb[7].mxu0 }
  0xf9   :  { %v476_v4 = vadd.f32 %v1385_v46, %v414_v3  ;;  %1069 = vmatprep.mubr.msk.f32.mxu1 %vm513_vm4, %v490_v63 }
  0xfa   :  { %1070 = vmatmul.mubr.msk.f32.gmra.mrb[10].mxu1 %vm513_vm4, %v491_v1  ;;  %v493_v7 = vmax.f32 %v477_v2, 0.0 }
  0xfb   :  { %v492_v5 = vmax.f32 %v476_v4, 0.0  ;;  %v1045_v6 = vpop.f32.mrb[8].mxu0 }
  0xfc   :  { %v479_v8 = vadd.f32 %v1045_v6, %v1385_v46  ;;  %v424_v9 = vpop.f32.mrb[9].mxu0 }
  0xfd   :  { %v478_v10 = vadd.f32 %v1385_v46, %v424_v9  ;;  %1072 = vmatprep.mubr.msk.f32.mxu1 %vm513_vm4, %v492_v5 }
  0xfe   :  { %1073 = vmatmul.mubr.msk.f32.gmra.mrb[12].mxu1 %vm513_vm4, %v493_v7  ;;  %v495_v13 = vmax.f32 %v479_v8, 0.0 }
  0xff   :  { %v494_v11 = vmax.f32 %v478_v10, 0.0  ;;  %v1048_v12 = vpop.f32.mrb[10].mxu0 }
 0x100   :  { %v440_v14 = vadd.f32 %v1048_v12, %v1022_v40  ;;  %v434_v15 = vpop.f32.mrb[11].mxu0  ;;  %v1115_v40 = vpack.c.bf16 %v767_v38, %v766_v37 }
 0x101   :  { %v435_v16 = vadd.f32 %v434_v15, %v236_v41  ;;  %1075 = vmatprep.mubr.msk.f32.mxu1 %vm513_vm4, %v494_v11  ;;  %v768_v41 = vld [vmem:[%s1507_s7 + $0x10] sm:$0xff] }
 0x102   :  { %v481_v17 = vadd.f32 %v1385_v46, %v440_v14  ;;  %1076 = vmatmul.mubr.msk.f32.gmra.mrb[14].mxu1 %vm513_vm4, %v495_v13 }
 0x103   :  { %v480_v18 = vadd.f32 %v1385_v46, %v435_v16  ;;  %v1051_v19 = vpop.f32.mrb[12].mxu0  ;;  %1116 = vmatpush3.bf16.msra.mxu1 %v1115_v40 }
 0x104   :  { %v450_v20 = vadd.f32 %v1051_v19, %v1025_v42  ;;  %v444_v21 = vpop.f32.mrb[13].mxu0  ;;  %v497_v24 = vmax.f32 %v481_v17, 0.0  ;;  %1117 = vmatprep.subr.bf16.mxu1 %v1176_v39  ;;  %v769_v42 = vld [vmem:[%s1507_s7 + $0x18] sm:$0xff] }
 0x105   :  { %v496_v22 = vmax.f32 %v480_v18, 0.0  ;;  %v445_v23 = vadd.f32 %v444_v21, %v246_v43  ;;  %v1118_v43 = vpack.c.bf16 %v769_v42, %v768_v41 }
 0x106   :  { %v483_v25 = vadd.f32 %v1385_v46, %v450_v20 }
 0x107   :  { %v482_v26 = vadd.f32 %v1385_v46, %v445_v23  ;;  %v1054_v27 = vpop.f32.mrb[14].mxu0  ;;  %1078 = vmatprep.mubr.msk.f32.mxu1 %vm513_vm4, %v496_v22  ;;  %1119 = vmatpush3.bf16.msra.mxu1 %v1118_v43 }
 0x108   :  { %v460_v28 = vadd.f32 %v1054_v27, %v1028_v44  ;;  %v454_v29 = vpop.f32.mrb[15].mxu0  ;;  %1079 = vmatmul.mubr.msk.f32.gmra.mrb[16].mxu1 %vm513_vm4, %v497_v24  ;;  %v499_v32 = vmax.f32 %v483_v25, 0.0  ;;  %1120 = vmatprep.subr.bf16.mxu1 %v1176_v39  ;;  %v770_v44 = vld [vmem:[%s1507_s7 + $0x20] sm:$0xff] }
 0x109   :  { %v498_v30 = vmax.f32 %v482_v26, 0.0  ;;  %v455_v31 = vadd.f32 %v454_v29, %v1380_v45  ;;  %v771_v45 = vld [vmem:[%s1507_s7 + $0x28] sm:$0xff] }
 0x10a   :  { %v485_v33 = vadd.f32 %v1385_v46, %v460_v28 }
 0x10b   :  { %v484_v34 = vadd.f32 %v1385_v46, %v455_v31  ;;  %1081 = vmatprep.mubr.msk.f32.mxu1 %vm513_vm4, %v498_v30  ;;  %v1121_v46 = vpack.c.bf16 %v771_v45, %v770_v44 }
 0x10c   :  { %1082 = vmatmul.mubr.msk.f32.gmra.mrb[18].mxu1 %vm513_vm4, %v499_v32  ;;  %v501_v36 = vmax.f32 %v485_v33, 0.0 }
 0x10d   :  { %v500_v35 = vmax.f32 %v484_v34, 0.0  ;;  %1122 = vmatpush3.bf16.msra.mxu1 %v1121_v46 }
 0x10e   :  { %1123 = vmatprep.subr.bf16.mxu1 %v1176_v39 }
 0x10f   :  { %1084 = vmatprep.mubr.msk.f32.mxu1 %vm513_vm4, %v500_v35 }
 0x110   :  { %1085 = vmatmul.mubr.msk.f32.gmra.mrb[20].mxu1 %vm513_vm4, %v501_v36 }
 0x111   :  { %1125 = vmatpush3.bf16.msra.mxu1 %v1124_v49  ;;  %1103 = vmatprep.mubr.msk.f32.mxu1 %vm1177_vm5, %v1178_v50 }
 0x1c5   :  { %v1065_v52 = vpop.f32.mrb[6].mxu1 }
 0x1c6   :  { %v634_v53 = vadd.f32 %v1065_v52, %v1447_v51  ;;  %v628_v54 = vpop.f32.mrb[7].mxu1 }
 0x1c7   :  { %v629_v55 = vadd.f32 %v1447_v51, %v628_v54 }
 0x1c8   :  { %v708_v57 = vmax.f32 %v634_v53, 0.0 }
 0x1c9   :  { %v1068_v56 = vpop.f32.mrb[8].mxu1  ;;  %v707_v60 = vmax.f32 %v629_v55, 0.0 }
 0x1ca   :  { %v644_v58 = vadd.f32 %v1068_v56, %v1447_v51  ;;  %v638_v59 = vpop.f32.mrb[9].mxu1  ;;  %v725_v1 = vsel %vm723_vm6, %v708_v57, -inf }
 0x1cb   :  { %v639_v61 = vadd.f32 %v1447_v51, %v638_v59  ;;  %v724_v5 = vsel %vm723_vm6, %v707_v60, -inf }
 0x1cc   :  { %v710_v62 = vmax.f32 %v644_v58, 0.0 }
 0x1cd   :  { %v709_v63 = vmax.f32 %v639_v61, 0.0  ;;  %v1071_v0 = vpop.f32.mrb[10].mxu1 }
 0x1ce   :  { %v728_v2 = vsel %vm723_vm6, %v710_v62, -inf  ;;  %v654_v3 = vadd.f32 %v1071_v0, %v1447_v51  ;;  %v648_v4 = vpop.f32.mrb[11].mxu1 }
 0x1cf   :  { %v729_v6 = vmax.f32 %v725_v1, %v728_v2  ;;  %v726_v7 = vsel %vm723_vm6, %v709_v63, -inf  ;;  %v649_v8 = vadd.f32 %v1447_v51, %v648_v4 }
 0x1d0   :  { %v727_v9 = vmax.f32 %v724_v5, %v726_v7  ;;  %v712_v10 = vmax.f32 %v654_v3, 0.0 }
 0x1d1   :  { %v711_v11 = vmax.f32 %v649_v8, 0.0  ;;  %v1074_v12 = vpop.f32.mrb[12].mxu1 }
 0x1d2   :  { %v732_v13 = vsel %vm723_vm6, %v712_v10, -inf  ;;  %v664_v14 = vadd.f32 %v1074_v12, %v1447_v51  ;;  %v658_v15 = vpop.f32.mrb[13].mxu1 }
 0x1d3   :  { %v733_v16 = vmax.f32 %v729_v6, %v732_v13  ;;  %v730_v17 = vsel %vm723_vm6, %v711_v11, -inf  ;;  %v659_v18 = vadd.f32 %v1447_v51, %v658_v15  ;;  %v938_v15 = vld [vmem:[%s1508_s8] ss:$0 sm:$0xff]  ;;  %s1179_s8 = smov [#allocation2]  }
 0x1d4   :  { %v731_v19 = vmax.f32 %v727_v9, %v730_v17  ;;  %v714_v20 = vmax.f32 %v664_v14, 0.0  ;;  %s878_s29 = sshll.u32 %s1179_s8, 4  ;;  %s879_s29 = int_to_ptr.vmem [resolvable:$true] %s878_s29 }
 0x1d5   :  { %v713_v21 = vmax.f32 %v659_v18, 0.0  ;;  %v1077_v22 = vpop.f32.mrb[14].mxu1  ;;  %s1152_s1 = scalar_lea.vmem %s879_s29, 32  ;;  %p1157_p1 = scmp.lt.s32.totalorder %s879_s29, %s879_s29 }
 0x1d6   :  { %v736_v23 = vsel %vm723_vm6, %v714_v20, -inf  ;;  %v668_v24 = vpop.f32.mrb[15].mxu1  ;;  %v674_v28 = vadd.f32 %v1077_v22, %v1447_v51  ;;  %p1153_p0 = scmp.ne.s32.totalorder %s879_s29, %s1152_s1  ;;  %p1158_p2 = scmp.lt.s32.totalorder %s1152_s1, %s1152_s1 }
 0x1d7   :  { %v737_v25 = vmax.f32 %v733_v16, %v736_v23  ;;  %v734_v26 = vsel %vm723_vm6, %v713_v21, -inf  ;;  %v669_v29 = vadd.f32 %v1447_v51, %v668_v24 }
 0x1d8   :  { %v735_v27 = vmax.f32 %v731_v19, %v734_v26  ;;  %v716_v32 = vmax.f32 %v674_v28, 0.0  ;;  %p1159_p3 = por %p1158_p2, %p1157_p1 }
 0x1d9   :  { %v715_v35 = vmax.f32 %v669_v29, 0.0 }
 0x1da   :  { %v738_v30 = vmax.f32 %v735_v27, %v737_v25  ;;  %v746_v40 = vsel %vm723_vm6, %v716_v32, -inf  ;;  %p1160_p4 = pnand %p1159_p3, %p1153_p0 }
 0x1db   :  { %v1080_v31 = vpop.f32.mrb[16].mxu1  ;;  %v745_v44 = vsel %vm723_vm6, %v715_v35, -inf }
 0x1dc   :  { %v684_v33 = vadd.f32 %v1080_v31, %v1447_v51  ;;  %v678_v34 = vpop.f32.mrb[17].mxu1  ;;  %v739_v53 = vrot.slane %v738_v30, 4 }
 0x1dd   :  { %v679_v36 = vadd.f32 %v1447_v51, %v678_v34 }
 0x1de   :  { %v718_v37 = vmax.f32 %v684_v33, 0.0  ;;  %v740_v63 = vmax.f32 %v738_v30, %v739_v53 }
 0x1df   :  { %v717_v38 = vmax.f32 %v679_v36, 0.0  ;;  %v1083_v39 = vpop.f32.mrb[18].mxu1 }
 0x1e0   :  { %v749_v41 = vsel %vm723_vm6, %v718_v37, -inf  ;;  %v694_v42 = vadd.f32 %v1083_v39, %v1447_v51  ;;  %v688_v43 = vpop.f32.mrb[19].mxu1  ;;  %v741_v4 = vrot.slane %v740_v63, 2 }
 0x1e1   :  { %v750_v45 = vmax.f32 %v746_v40, %v749_v41  ;;  %v747_v46 = vsel %vm723_vm6, %v717_v38, -inf  ;;  %v689_v47 = vadd.f32 %v1447_v51, %v688_v43 }
 0x1e2   :  { %v748_v48 = vmax.f32 %v745_v44, %v747_v46  ;;  %v720_v49 = vmax.f32 %v694_v42, 0.0  ;;  %v742_v7 = vmax.f32 %v740_v63, %v741_v4 }
 0x1e3   :  { %v719_v50 = vmax.f32 %v689_v47, 0.0  ;;  %v1086_v52 = vpop.f32.mrb[20].mxu1 }
 0x1e4   :  { %v753_v54 = vsel %vm723_vm6, %v720_v49, -inf  ;;  %v704_v55 = vadd.f32 %v1086_v52, %v1447_v51  ;;  %v698_v56 = vpop.f32.mrb[21].mxu1  ;;  %v743_v10 = vrot.slane %v742_v7, 1 }
 0x1e5   :  { %v754_v57 = vmax.f32 %v750_v45, %v753_v54  ;;  %v751_v58 = vsel %vm723_vm6, %v719_v50, -inf  ;;  %v699_v59 = vadd.f32 %v1447_v51, %v698_v56 }
 0x1e6   :  { %v752_v60 = vmax.f32 %v748_v48, %v751_v58  ;;  %v722_v61 = vmax.f32 %v704_v55, 0.0  ;;  %v744_v51 = vmax.f32 %v742_v7, %v743_v10 }
 0x1e7   :  { %v721_v62 = vmax.f32 %v699_v59, 0.0 }
 0x1e8   :  { %v757_v0 = vsel %vm723_vm6, %v722_v61, -inf }
 0x1e9   :  { %v758_v1 = vmax.f32 %v754_v57, %v757_v0  ;;  %v755_v2 = vsel %vm723_vm6, %v721_v62, -inf }
 0x1ea   :  { %v756_v3 = vmax.f32 %v752_v60, %v755_v2 }
 0x1ec   :  { %v759_v5 = vmax.f32 %v756_v3, %v758_v1 }
 0x1ee   :  { %v760_v6 = vrot.slane %v759_v5, 4 }
 0x1f0   :  { %v761_v8 = vmax.f32 %v759_v5, %v760_v6 }
 0x1f2   :  { %v762_v9 = vrot.slane %v761_v8, 2 }
 0x1f4   :  { %v763_v11 = vmax.f32 %v761_v8, %v762_v9 }
 0x1f6   :  { %v764_v12 = vrot.slane %v763_v11, 1 }
 0x1f8   :  { %v765_v13 = vmax.f32 %v763_v11, %v764_v12 }
 0x1fa   :  { %v784_v14 = vsel %vm783_vm7, %v765_v13, %v744_v51 }
 0x1fb   :  { %1104 = vmatmul.mubr.msk.f32.vlgmr.msra.gmra.mrb[22].mxu1 %vm723_vm6, %v784_v14 }
 0x2ce   :  { %v853_v16 = vpop.f32.mrb[22].mxu1 }
 0x2cf   :  { %v854_v17 = vadd.f32 %v938_v15, %v853_v16  ;;  %v1105_v18 = vpop.f32.mrb[23].mxu1 }
 0x2d1   :  { %v858_v19 = vsel %vm857_vm8, %v854_v17, -inf }
 0x2d2   :  { %859 = vmax.xlane.f32.xlu0 %v858_v19 }
 0x35f   :  { %v860_v20 = vpop.xlane.xlu0 %859 }
 0x360   :  { %v861_v21 = vsub.f32 %v854_v17, %v860_v20 }
 0x362   :  { %v862_v22 = vmul.f32 1.442695, %v861_v21 }
 0x364   :  { %1148 = vpow2.f32 %v862_v22 }
 0x36e   :  { %v1149_v23 = vpop.eup %1148 }
 0x36f   :  { %v864_v24 = vsel %vm857_vm8, %v1149_v23, 0.0 }
 0x370   :  { %865 = vadd.xlane.f32.xlu0 %v864_v24 }
 0x3fd   :  { %v866_v25 = vpop.xlane.xlu0 %865 }
 0x3fe   :  { %1150 = vlog2.f32 %v866_v25 }
 0x408   :  { %v1151_v26 = vpop.eup %1150 }
 0x409   :  { %v868_v27 = vmul.f32 0.6931472, %v1151_v26 }
 0x40b   :  { %v869_v28 = vadd.f32 %v868_v27, %v860_v20 }
 0x40d   :  { %v870_v29 = vsub.f32 %v854_v17, %v869_v28 }
 0x40f   :  { %871 = vst.msk [vmem:[#allocation2] sm:$0x3] %vm857_vm8, %v870_v29 }
 0x410   :  { %1163 = shalt.err (!%p1160_p4)
}
 0x411   :  { %s1164_s11 = scalar_lea.hbm %s1509_s9, 32 }
 0x412   :  { %p1165_p5 = scmp.ne.s32.totalorder %s1509_s9, %s1164_s11  ;;  %p1168_p6 = scmp.lt.u32.totalorder %s1164_s11, %s1509_s9 }
 0x414   :  { %p1170_p7 = pnand %p1168_p6, %p1165_p5 }
 0x416   :  { %1173 = shalt.err (!%p1170_p7)
}
 0x417   :  { %881 = dma.vmem_to_hbm [thread:$0]  %s879_s29, 32, %s1509_s9, [#allocation3]  }
 0x418   :  { %1174 = dma.done.wait [#allocation3], 32  }
 0x419   :  { %1175 = vsyncadd [#allocation3], 4294967264 }
 0x41a   :  { %885 = vsyncpa [#allocation3], 1 }

</bundles_post_ra>
